<compile_context>
chip_gen: v6e
topology: v6e:2x2x1
jax: 0.10.0
libtpu: 0.0.40
codegen_flags: <defaults>
</compile_context>

<pallas_src>
import functools

import jax
import jax.numpy as jnp
from jax.experimental import pallas as pl
from jax.experimental.pallas import tpu as pltpu


def autopad(k, p=None, d=1):
    """Same as ultralytics autopad: 'same'-style padding."""
    if d > 1:
        k = d * (k - 1) + 1
    if p is None:
        p = k // 2
    return p


def _round_up(x, m):
    return -(-x // m) * m


def _pick_row_tile(h_out, n_batch, lane_width):
    """Largest multiple-of-8 divisor of h_out whose f32 epilogue (acc + SiLU
    temps) stays within ~32 vregs.  Leaves >=2 row blocks only when the batch
    axis cannot feed a second TensorCore (v7x megacore)."""
    budget_rows = max(8, (256 * 128) // max(lane_width, 1))   # ~32 f32 vregs
    cap = min(h_out, budget_rows)
    if n_batch < 2 and h_out >= 16:
        cap = min(cap, max(8, ((h_out // 2) // 8) * 8))
    best = None
    for t in range(8, cap + 1, 8):
        if h_out % t == 0:
            best = t
    return best if best is not None else h_out


def _conv_bn_silu_kernel(x_ref, w_ref, o_ref, *, k, s, d, tr, pad_lanes):
    """One (batch, output-row-block) tile per grid step.

    x_ref: (Hp, W*C1)       bf16 input; H zero-padded, W folded into lanes
    w_ref: (Kc_pad, Wo*C2)  bf16 block-Toeplitz weights; BN scale folded in,
                            row Kc holds the folded BN bias (hit by bias lane)
    o_ref: (tr, Wo*C2)      lane-dense output row block
    """
    r = pl.program_id(1)
    row0 = pl.multiple_of(r * (tr * s), tr * s)     # first padded input row
    span = (tr - 1) * s + (k - 1) * d + 1           # input rows needed
    xb = x_ref[pl.ds(row0, span), :]                # (span, W*C1)

    # K row-taps (kh): sublane-offset slices concatenated on the lane axis to
    # build the im2col LHS for this row block.
    taps = [xb[kh * d:kh * d + (tr - 1) * s + 1:s, :] for kh in range(k)]

    # Pad the contraction to Kc_pad lanes (256 at the test shape); lane 0 of
    # the pad block is a constant 1 that multiplies the folded-BN bias row.
    bias_tap = (jax.lax.broadcasted_iota(jnp.int32, (tr, pad_lanes), 1) == 0
                ).astype(jnp.bfloat16)
    lhs = jnp.concatenate(taps + [bias_tap], axis=-1)        # (tr, Kc_pad)

    # Single wide MXU matmul (bias included via the bias lane), f32 accumulate.
    acc = jnp.dot(lhs, w_ref[...], preferred_element_type=jnp.float32)

    # SiLU epilogue, kept f32 throughout (v5e has no bf16 VPU/EUP path).
    o_ref[...] = (acc * jax.nn.sigmoid(acc)).astype(o_ref.dtype)


def multistream_conv(x, weight_oihw, gamma, beta, running_mean, running_var,
                     *, k=3, s=1, p=None, g=1, d=1, eps=1e-3,
                     channels_last=False, out_dtype=None,
                     out_channels_last=False):
    """Pallas implementation of MultiStreamConv.forward (Conv + BN + SiLU).

    channels_last:     input already NHWC (skips the NCHW->NHWC transpose).
    out_dtype:         output dtype; defaults to x.dtype.  Pass jnp.bfloat16
                       to halve output HBM traffic when the consumer allows.
    out_channels_last: return (N, Ho, Wo, C2) and skip the NCHW round trip.
    """
    # TODO(synk): grouped convolution (g > 1) not implemented in the kernel.
    assert g == 1, "only groups=1 supported"

    if channels_last:
        n, h, w, c1 = x.shape
        x_nhwc = x
    else:
        n, c1, h, w = x.shape
        x_nhwc = jnp.transpose(x, (0, 2, 3, 1))
    c2 = weight_oihw.shape[0]
    out_dtype = x.dtype if out_dtype is None else out_dtype

    pad = autopad(k, p, d)
    h_out = (h + 2 * pad - d * (k - 1) - 1) // s + 1
    w_out = (w + 2 * pad - d * (k - 1) - 1) // s + 1

    # ---- Wrapper glue (weight prep is tiny, runs once per call) ------------
    # Input: (N, H, W*C1); pad H only (the 'same' padding along W is absorbed
    # into the Toeplitz weights), cast to bf16 for the MXU.
    x_rows = x_nhwc.reshape(n, h, w * c1)
    x_pad = jnp.pad(x_rows, ((0, 0), (pad, pad), (0, 0))).astype(jnp.bfloat16)
    hp = h + 2 * pad

    # Fold BN scale into the conv weights; the BN bias becomes a weight row
    # driven by a constant-1 lane (rides the MXU, no separate bias stream).
    scale = gamma / jnp.sqrt(running_var + eps)                       # (C2,)
    bias = beta - running_mean * scale                                # (C2,)
    w_hwio = jnp.transpose(weight_oihw, (2, 3, 1, 0)).astype(jnp.float32)
    w_hwio = w_hwio * scale[None, None, None, :]                      # (K,K,C1,C2)

    # Block-Toeplitz ("lowered conv") weights: map lane-flattened input rows
    # (kh, jw, ci) to lane-flattened output rows (wo, co), absorbing kw tap
    # shifts and the zero padding along W.
    # onehot[kw, jw, wo] = 1  iff  jw == wo*s + kw*d - pad  (and jw in range).
    jw_tgt = (jnp.arange(w_out)[None, :] * s
              + jnp.arange(k)[:, None] * d - pad)                     # (K, Wo)
    onehot = (jnp.arange(w)[None, :, None] == jw_tgt[:, None, :]
              ).astype(jnp.float32)                                   # (K, W, Wo)
    w_toep = jnp.einsum("xjw,hxio->hjiwo", onehot, w_hwio)            # (K,W,C1,Wo,C2)
    kc = k * w * c1
    w_toep = w_toep.reshape(kc, w_out * c2)

    # Pad the contraction to a clean MXU depth (>= kc+1, multiple of 128;
    # 256 at the test shape): row kc carries the folded BN bias, rest zeros.
    kc_pad = max(256, _round_up(kc + 1, 128))
    pad_lanes = kc_pad - kc
    bias_row = jnp.tile(bias.astype(jnp.float32), w_out).reshape(1, w_out * c2)
    w_full = jnp.concatenate(
        [w_toep, bias_row,
         jnp.zeros((pad_lanes - 1, w_out * c2), jnp.float32)], axis=0)
    w_full = w_full.astype(jnp.bfloat16)                              # (Kc_pad, Wo*C2)
    # TODO(synk): at detector widths, tile w_full over Wo (extra parallel grid
    # axis + pipeline_mode=pl.Buffered(1) on the weight spec) to bound the
    # O(K*W*C1*Wo*C2) weight bytes / W-over-k FLOP inflation and fit v7x's
    # 64 MiB VMEM; at W=16 the single 64 KiB slab is overhead-bound.

    # ---- Pallas call --------------------------------------------------------
    tr = _pick_row_tile(h_out, n, w_out * c2)
    kernel = functools.partial(_conv_bn_silu_kernel, k=k, s=s, d=d, tr=tr,
                               pad_lanes=pad_lanes)

    in_bytes = hp * w * c1 * 2
    w_bytes = kc_pad * w_out * c2 * 2
    out_bytes = tr * w_out * c2 * jnp.dtype(out_dtype).itemsize
    vmem_limit = int(min(max(8 * (in_bytes + w_bytes + out_bytes), 16 << 20),
                         64 << 20))

    out_rows = pl.pallas_call(
        kernel,
        out_shape=jax.ShapeDtypeStruct((n, h_out, w_out * c2), out_dtype),
        grid_spec=pltpu.PrefetchScalarGridSpec(
            num_scalar_prefetch=0,
            grid=(n, h_out // tr),
            in_specs=[
                # Full H-padded image per batch item; constant block index
                # along the row axis keeps it VMEM-resident.
                # TODO(synk): for large images, switch to memory_space=pl.ANY
                # + manual windowed make_async_copy (v7x VMEM budget).
                pl.BlockSpec((None, hp, w * c1), lambda b, r: (b, 0, 0)),
                pl.BlockSpec((kc_pad, w_out * c2), lambda b, r: (0, 0)),
            ],
            out_specs=pl.BlockSpec((None, tr, w_out * c2),
                                   lambda b, r: (b, r, 0)),
        ),
        compiler_params=pltpu.CompilerParams(
            dimension_semantics=("parallel", "parallel"),
            vmem_limit_bytes=vmem_limit),
    )(x_pad, w_full)

    out = out_rows.reshape(n, h_out, w_out, c2)
    if out_channels_last:
        return out
    return jnp.transpose(out, (0, 3, 1, 2))                           # NCHW


def _reference(x_nchw, weight_oihw, gamma, beta, mean, var, *, k, s, p, d,
               eps=1e-3):
    """Pure-JAX f32 reference (conv + BN + SiLU) for a sanity check."""
    pad = autopad(k, p, d)
    y = jax.lax.conv_general_dilated(
        x_nchw.astype(jnp.float32), weight_oihw.astype(jnp.float32),
        window_strides=(s, s), padding=((pad, pad), (pad, pad)),
        rhs_dilation=(d, d),
        dimension_numbers=("NCHW", "OIHW", "NCHW"))
    scale = (gamma / jnp.sqrt(var + eps)).reshape(1, -1, 1, 1)
    bias = (beta - mean * gamma / jnp.sqrt(var + eps)).reshape(1, -1, 1, 1)
    y = y * scale + bias
    return y * jax.nn.sigmoid(y)


if __name__ == "__main__":
    # Module config: MultiStreamConv(c1=4, c2=8, k=3, s=1)
    N, C1, H, W = 2, 4, 16, 16
    C2, K, S, D = 8, 3, 1, 1

    key = jax.random.PRNGKey(0)
    kx, kw, kg, kb, km, kv = jax.random.split(key, 6)

    x = jax.random.normal(kx, (N, C1, H, W), dtype=jnp.float32)
    # Conv2d weight (bias=False): (c2, c1, k, k)
    weight = jax.random.normal(kw, (C2, C1, K, K), dtype=jnp.float32) * 0.1
    # BatchNorm2d(c2) params / running stats (deterministic, synthetic).
    gamma = 1.0 + 0.1 * jax.random.normal(kg, (C2,), dtype=jnp.float32)
    beta = 0.1 * jax.random.normal(kb, (C2,), dtype=jnp.float32)
    running_mean = 0.1 * jax.random.normal(km, (C2,), dtype=jnp.float32)
    running_var = jnp.abs(1.0 + 0.1 * jax.random.normal(kv, (C2,),
                                                        dtype=jnp.float32))

    out = multistream_conv(x, weight, gamma, beta, running_mean, running_var,
                           k=K, s=S, p=None, g=1, d=D)
    out = jax.block_until_ready(out)

    ref = _reference(x, weight, gamma, beta, running_mean, running_var,
                     k=K, s=S, p=None, d=D)
    assert out.shape == (N, C2, H, W)
    # bf16 matmul inputs (f32 accumulate) vs. f32 reference -> loose tolerance.
    assert jnp.allclose(out, ref, atol=2e-2, rtol=2e-2)

    print("KERNEL_OK")
</pallas_src>

<mosaic_0001>
module attributes {stable_mosaic.version = 11 : i64} {
  func.func @_conv_bn_silu_kernel(%arg0: i32, %arg1: i32, %arg2: memref<1x18x64xbf16, #tpu.memory_space<vmem>>, %arg3: memref<256x128xbf16, #tpu.memory_space<vmem>>, %arg4: memref<1x16x128xf32, #tpu.memory_space<vmem>>) attributes {dimension_semantics = [#tpu.dimension_semantics<parallel>, #tpu.dimension_semantics<parallel>], iteration_bounds = array<i64: 2, 1>, scalar_prefetch = 0 : i64, scratch_operands = 0 : i64, tpu.core_type = #tpu.core_type<tc>, window_params = [{transform_indices = @transform_0, window_bounds = array<i64: 1, 18, 64>}, {pipeline_mode = #tpu.pipeline_mode<synchronous>, transform_indices = @transform_1, window_bounds = array<i64: 256, 128>}, {transform_indices = @transform_2, window_bounds = array<i64: 1, 16, 128>}]} {
    %c16_i32 = arith.constant 16 : i32
    %0 = arith.muli %arg1, %c16_i32 : i32
    %1 = tpu.assume_multiple %0, 16 : i32
    %c0 = arith.constant 0 : index
    %2 = arith.index_cast %1 : i32 to index
    %c0_0 = arith.constant 0 : index
    %3 = vector.load %arg2[%c0, %2, %c0_0] : memref<1x18x64xbf16, #tpu.memory_space<vmem>>, vector<1x18x64xbf16>
    %4 = vector.shape_cast %3 : vector<1x18x64xbf16> to vector<18x64xbf16>
    %5 = vector.extract_strided_slice %4 {offsets = [0, 0], sizes = [16, 64], strides = [1, 1]} : vector<18x64xbf16> to vector<16x64xbf16>
    %6 = vector.extract_strided_slice %4 {offsets = [1, 0], sizes = [16, 64], strides = [1, 1]} : vector<18x64xbf16> to vector<16x64xbf16>
    %7 = vector.extract_strided_slice %4 {offsets = [2, 0], sizes = [16, 64], strides = [1, 1]} : vector<18x64xbf16> to vector<16x64xbf16>
    %8 = tpu.iota {dimensions = array<i32: 1>} : vector<16x64xi32>
    %c0_i32 = arith.constant 0 : i32
    %9 = vector.broadcast %c0_i32 : i32 to vector<16x64xi32>
    %10 = arith.cmpi eq, %8, %9 : vector<16x64xi32>
    %11 = arith.extui %10 : vector<16x64xi1> to vector<16x64xi32>
    %12 = arith.sitofp %11 : vector<16x64xi32> to vector<16x64xf32>
    %13 = arith.truncf %12 : vector<16x64xf32> to vector<16x64xbf16>
    %14 = tpu.concatenate %5, %6, %7, %13 in 1 : vector<16x64xbf16>, vector<16x64xbf16>, vector<16x64xbf16>, vector<16x64xbf16> -> vector<16x256xbf16>
    %c0_1 = arith.constant 0 : index
    %c0_2 = arith.constant 0 : index
    %15 = vector.load %arg3[%c0_1, %c0_2] : memref<256x128xbf16, #tpu.memory_space<vmem>>, vector<256x128xbf16>
    %cst = arith.constant dense<0.000000e+00> : vector<16x128xf32>
    %16 = tpu.matmul %14, %15, %cst {dimension_numbers = #tpu.dot_dimension_numbers<[1], [0], [0], [1], [0, 0, 1, 1], [], []>} : vector<16x256xbf16>, vector<256x128xbf16>, vector<16x128xf32> -> vector<16x128xf32>
    %17 = arith.negf %16 : vector<16x128xf32>
    %18 = math.exp %17 : vector<16x128xf32>
    %cst_3 = arith.constant 1.000000e+00 : f32
    %19 = vector.broadcast %cst_3 : f32 to vector<16x128xf32>
    %20 = arith.addf %19, %18 : vector<16x128xf32>
    %21 = arith.divf %19, %20 : vector<16x128xf32>
    %22 = arith.mulf %16, %21 : vector<16x128xf32>
    %c0_4 = arith.constant 0 : index
    %c0_5 = arith.constant 0 : index
    %c0_6 = arith.constant 0 : index
    %23 = vector.load %arg4[%c0_4, %c0_5, %c0_6] : memref<1x16x128xf32, #tpu.memory_space<vmem>>, vector<1x16x128xf32>
    %24 = vector.shape_cast %23 : vector<1x16x128xf32> to vector<16x128xf32>
    %25 = vector.shape_cast %22 : vector<16x128xf32> to vector<1x16x128xf32>
    tpu.vector_store %arg4[%c0_4, %c0_5, %c0_6], %25 {strides = array<i32>} : memref<1x16x128xf32, #tpu.memory_space<vmem>>, vector<1x16x128xf32>,
    return
  }
  func.func @transform_0(%arg0: i32, %arg1: i32) -> (i32, i32, i32) {
    %c0_i32 = arith.constant 0 : i32
    %c0_i32_0 = arith.constant 0 : i32
    %c0_i32_1 = arith.constant 0 : i32
    return %arg0, %c0_i32, %c0_i32_0 : i32, i32, i32
  }
  func.func @transform_1(%arg0: i32, %arg1: i32) -> (i32, i32) {
    %c0_i32 = arith.constant 0 : i32
    %c0_i32_0 = arith.constant 0 : i32
    %c0_i32_1 = arith.constant 0 : i32
    return %c0_i32, %c0_i32_0 : i32, i32
  }
  func.func @transform_2(%arg0: i32, %arg1: i32) -> (i32, i32, i32) {
    %c0_i32 = arith.constant 0 : i32
    %c0_i32_0 = arith.constant 0 : i32
    return %arg0, %arg1, %c0_i32 : i32, i32, i32
  }
}

</mosaic_0001>

<bundles_post_ra>
// kernel: tpu_custom_call.1
= control target key start
LH: loop header
LB: loop body
LE: loop exit
PB: predicated region body
PF: predicated region fallthrough
CT: control target
= control target key end

     0   :  { %7 = vsyncpa [#allocation3], 0  ;;  %s937_s0 = inlined_call_operand.vmem [shape: bf16[2,18,64], index: 0, kind: input, shape index: {}]   ;;  %s938_s1 = inlined_call_operand.hbm [shape: bf16[256,128], index: 1, kind: input, shape index: {}]   ;;  %s939_s2 = inlined_call_operand.hbm [shape: f32[2,16,128], index: 2, kind: output, shape index: {}]  }
   0x1   :  { %8 = vsyncpa [#allocation4], 0 }
   0x2   :  { %10 = vsyncpa [#allocation4 + $0x1], 0  ;;  %s801_s9 = smov 0   ;;  %s803_s10 = smov 0  }
   0x3   :  { %s805_s11 = smov 0   ;;  %s807_s12 = smov 0  }
   0x4   :  { %s809_s13 = smov 0   ;;  %s811_s14 = smov 0  }
   0x5 LB: > { %s513_s15 = sadd.s32 4294967295, %s776_s14   ;;  %s514_s16 = sadd.s32 4294967294, %s776_s14   ;;  %s776_s14 = sphi %s811_s14, %s16_s14   ;;  %s772_s13 = sphi %s809_s13, %s948_s13   ;;  %s768_s12 = sphi %s807_s12, %s947_s12   ;;  %s764_s11 = sphi %s805_s11, %s946_s11   ;;  %s760_s10 = sphi %s803_s10, %s945_s10   ;;  %s756_s9 = sphi %s801_s9, %s944_s9  }
   0x6   : > { %s28_s17 = sadd.s32 1, %s772_s13  ;;  %s84_s18 = sadd.s32 1, %s764_s11 }
   0x7   : > { %p30_p0 = scmp.ge.s32.totalorder %s28_s17, 2  ;;  %p94_p1 = scmp.ne.s32.totalorder %s764_s11, %s760_s10 }
   0x8   : > { %p95_p2 = scmp.eq.s32.totalorder %s513_s15, 1  ;;  %p100_p3 = scmp.ne.s32.totalorder %s760_s10, %s756_s9 }
   0x9   : > { %s950_s17 = smov (%p30_p0, %s28_s17), 0  ;;  %p101_p5 = scmp.eq.s32.totalorder %s514_s16, 1 }
   0xa   : > { %p841_p4 = por %p95_p2, %p94_p1  ;;  %s79_s20 = ssub.s32 %s772_s13, %s950_s17 }
   0xb   : > { %p515_p6 = scmp.ge.s32.totalorder %s776_s14, 1  ;;  %p82_p7 = scmp.eq.s32.totalorder %s79_s20, 0 }
   0xc   : > { %p848_p8 = por %p101_p5, %p100_p3  ;;  %p108_p9 = scmp.lt.s32.totalorder %s776_s14, 3 }
   0xd   : > { %s854_s22 = scalar_select %p82_p7, %s764_s11, %s84_s18  }
   0xe   : > { %p856_p10 = pnand %p515_p6, %p108_p9  ;;  %p860_p11 = scmp.eq.s32.totalorder %s513_s15, 0 }
   0xf   : > { %s778_s25 = smov [#allocation2]  }
  0x10   : > { %p578_p12 = pneg %p856_p10  ;;  %s120_s26 = sshll.u32 %s778_s25, 4  ;;  %s121_s26 = int_to_ptr.vmem [resolvable:$true] %s120_s26 }
  0x11   : > { %s681_s27 = scalar_lea.vmem %s121_s26, 2048  ;;  %p689_p5 = scmp.lt.s32.totalorder %s121_s26, %s121_s26 }
  0x12   : > { %p579_p13 = pnand %p860_p11, %p578_p12  ;;  %p682_p1 = scmp.ne.s32.totalorder %s121_s26, %s681_s27 }
  0x13   : > { %p690_p6 = scmp.lt.s32.totalorder %s681_s27, %s681_s27 }
  0x14   : > { %p672_p0 = pneg %p579_p13 }
  0x15   : > { %p691_p7 = por %p690_p6, %p689_p5 }
  0x16   : > { %p684_p2 = pnand %p682_p1, %p672_p0 }
  0x18   : > { %p685_p3 = pneg %p684_p2 }
  0x1a   : > { %p692_p9 = pnand %p691_p7, %p685_p3 }
  0x1c   : > { %695 = shalt.err (!%p692_p9)
}
  0x1d   : > { %s779_s28 = smov 64   ;;  %s780_s29 = smov 4  }
  0x1e   : > { %581 = dma.hbm_to_vmem [thread:$0]  (!%p579_p13), %s938_s1, 2048, %s121_s26, [#allocation3], %s779_s28, %s779_s28, %s780_s29  }
  0x1f   : > { %144 = sbr.rel (%p856_p10) target bundleno = 417 (0x1a1), region = 28 }
  0x24   : > { %747 = dma.done.wait (%p860_p11), [#allocation3], 2048  }
  0x25   : > { %749 = vsyncadd (%p860_p11), [#allocation3], 4294965248  ;;  %v181_v0 = vlaneseq  ;;  %p166_p12 = scmp.lt.s32.totalorder %s768_s12, 1  ;;  %v781_v2 = vmov 0.0   ;;  %vm195_vm1 = vsmask.f32 7424 }
  0x26   : > { %s782_s15 = smov 64   ;;  %v646_v7 = vld [vmem:[#allocation2 + $0x78] sm:$0xff]   ;;  %v648_v12 = vld [vmem:[#allocation2 + $0x70] sm:$0xff]   ;;  %v650_v17 = vld [vmem:[#allocation2 + $0x68] sm:$0xff]   ;;  %vm210_vm2 = vcmask 1046528   ;;  %vm217_vm3 = vcmask 523264  }
  0x27   : > { %v182_v1 = vand.u32 127, %v181_v0  ;;  %s167_s4 = scalar_select %p166_p12, %s768_s12, 1  ;;  %v647_v11 = vld [vmem:[#allocation2 + $0x38] sm:$0xff]   ;;  %549 = vmatprep.subr.bf16.mxu0 %v646_v7  ;;  %v649_v15 = vld [vmem:[#allocation2 + $0x30] sm:$0xff]   ;;  %v651_v19 = vld [vmem:[#allocation2 + $0x28] sm:$0xff]  }
  0x28   : > { %550 = vmatpush3.bf16.msra.mxu0 %v647_v11  ;;  %v652_v20 = vld [vmem:[#allocation2 + $0x60] sm:$0xff]   ;;  %v654_v22 = vld [vmem:[#allocation2 + $0x58] sm:$0xff]   ;;  %v656_v24 = vld [vmem:[#allocation2 + $0x50] sm:$0xff]   ;;  %s163_s16 = sand.u32 1, %s760_s10   ;;  %s548_s24 = sshll.u32 %s768_s12, 8 }
  0x29   : > { %vm183_vm0 = vcmp.eq.s32.totalorder %v182_v1, 0  ;;  %s571_s5 = smul.u32 12, %s167_s4  ;;  %551 = vmatprep.subr.bf16.mxu0 %v648_v12  ;;  %v653_v21 = vld [vmem:[#allocation2 + $0x20] sm:$0xff]   ;;  %v655_v23 = vld [vmem:[#allocation2 + $0x18] sm:$0xff]   ;;  %v657_v25 = vld [vmem:[#allocation2 + $0x10] sm:$0xff]   ;;  %s520_s18 = sshll.u32 %s163_s16, 4 }
  0x2a   : > { %v522_v3 = vsel %vm183_vm0, 1.0, %v781_v2  ;;  %v658_v26 = vld [vmem:[#allocation2 + $0x48] sm:$0xff]   ;;  %v660_v28 = vld [vmem:[#allocation2 + $0x40] sm:$0xff]   ;;  %s165_s20 = scalar_lea.vmem [#allocation5], %s520_s18  ;;  %s890_s27 = scalar_lea.hbm %s939_s2, %s548_s24 }
  0x2b   : > { %v186_v4 = vpack.c.bf16 %v522_v3, %v522_v3  ;;  %s170_s8 = scalar_lea.vmem %s937_s0, %s571_s5  ;;  %v659_v27 = vld [vmem:[#allocation2 + $0x8] sm:$0xff]   ;;  %v661_v29 = vld [vmem:[#allocation2] sm:$0xff]   ;;  %s426_s23 = sshll.u32 %s165_s20, 4  ;;  %s885_s23 = int_to_ptr.vmem [resolvable:$true] %s426_s23 }
  0x2c   : > { %v644_v5 = vld [vmem:[%s170_s8] sm:$0xff]   ;;  %v645_v6 = vld [vmem:[%s170_s8 + $0x8] ss:$0 sps:$4 sm:$0x11]   ;;  %552 = vmatpush3.bf16.msra.mxu0 %v649_v15  ;;  %s892_s28 = scalar_lea.sflag [#allocation4], %s163_s16  ;;  %s696_s29 = scalar_lea.vmem %s885_s23, 256 }
  0x2d   : > { %215 = vrot.lane.b32.xlu0 %v186_v4, %s782_s15  ;;  %v197_v8 = vshrl.u32 %v644_v5, 16  ;;  %v199_v9 = vshll.u32 %v644_v5, 16  ;;  %v204_v10 = vshll.u32 %v645_v6, 16  ;;  %553 = vmatprep.subr.bf16.mxu0 %v650_v17  ;;  %v211_v30 = vrot.slane %v644_v5, 1  ;;  %p697_p10 = scmp.ne.s32.totalorder %s885_s23, %s696_s29  ;;  %s783_s12 = smov [#allocation5]  }
  0x2e   : > { %v212_v31 = vrot.slane %v645_v6, 1  ;;  %s700_s30 = sshll.u32 %s783_s12, 4  ;;  %s701_s30 = int_to_ptr.vmem [resolvable:$false] %s700_s30 }
  0x2f   : > { %v201_v13 = vrot.slane %v199_v9, 1  ;;  %v206_v14 = vrot.slane %v204_v10, 1  ;;  %p698_p11 = pnand %p697_p10, %p841_p4  ;;  %s702_s3 = scalar_lea.vmem %s701_s30, 512 }
  0x30   : > { %554 = vmatpush3.bf16.msra.mxu0 %v651_v19  ;;  %v213_v32 = vsel %vm210_vm2, %v211_v30, %v212_v31  ;;  %p703_p0 = scmp.lt.s32.totalorder %s885_s23, %s701_s30  ;;  %p704_p1 = scmp.lt.s32.totalorder %s702_s3, %s696_s29 }
  0x31   : > { %v202_v16 = vor.u32 %v201_v13, %v197_v8  ;;  %555 = vmatprep.subr.bf16.mxu0 %v652_v20  ;;  %p699_p13 = pneg %p698_p11 }
  0x32   : > { %p705_p2 = por %p704_p1, %p703_p0 }
  0x33   : > { %v207_v18 = vsel %vm195_vm1, %v202_v16, %v206_v14 }
  0x34   : > { %208 = vrot.lane.b32.xlu0 %v207_v18, %s782_s15  ;;  %556 = vmatpush3.bf16.msra.mxu0 %v653_v21  ;;  %p706_p3 = pnand %p705_p2, %p699_p13 }
  0x35   : > { %557 = vmatprep.subr.bf16.mxu0 %v654_v22 }
  0x38   : > { %558 = vmatpush3.bf16.msra.mxu0 %v655_v23 }
  0x39   : > { %559 = vmatprep.subr.bf16.mxu0 %v656_v24 }
  0x3c   : > { %560 = vmatpush3.bf16.msra.mxu0 %v657_v25 }
  0x3d   : > { %561 = vmatprep.subr.bf16.mxu0 %v658_v26 }
  0x40   : > { %562 = vmatpush3.bf16.msra.mxu0 %v659_v27 }
  0x41   : > { %563 = vmatprep.subr.bf16.mxu0 %v660_v28 }
  0x44   : > { %564 = vmatpush3.bf16.msra.mxu0 %v661_v29 }
  0x9f   : > { %v216_v33 = vpop.permute.xlu0 %215 }
  0xa0   : > { %v223_v34 = vsel %vm217_vm3, %v213_v32, %v216_v33 }
  0xa1   : > { %385 = vmatprep.mubr.bf16.mxu0 %v223_v34 }
  0xa6   : > { %v209_v35 = vpop.permute.xlu0 %208 }
  0xa7   : > { %v219_v36 = vsel %vm217_vm3, %v644_v5, %v209_v35 }
  0xa8   : > { %386 = vmatmul.mubr.bf16.vlgmr.msra.gmra.mxu0 %v219_v36 }
 0x168   : > { %v565_v37 = vpop.f32.mrf.mxu0 }
 0x16a   : > { %v566_v38 = vpop.f32.mrf.mxu0 }
 0x16b   : > { %v567_v39 = vadd.f32 %v566_v38, %v565_v37 }
 0x16c   : > { %v568_v40 = vpop.f32.mrf.mxu0 }
 0x16d   : > { %v541_v41 = vmul.f32 -1.442695, %v567_v39 }
 0x16e   : > { %v569_v42 = vpop.f32.mrf.mxu0 }
 0x16f   : > { %662 = vpow2.f32 %v541_v41  ;;  %v570_v43 = vadd.f32 %v569_v42, %v568_v40 }
 0x171   : > { %v542_v44 = vmul.f32 -1.442695, %v570_v43 }
 0x173   : > { %664 = vpow2.f32 %v542_v44 }
 0x17c   : > { %v663_v45 = vpop.eup %662 }
 0x17d   : > { %v400_v46 = vadd.f32 1.0, %v663_v45 }
 0x17f   : > { %666 = vrcp.f32 %v400_v46 }
 0x180   : > { %v665_v47 = vpop.eup %664 }
 0x181   : > { %v401_v48 = vadd.f32 1.0, %v665_v47 }
 0x183   : > { %668 = vrcp.f32 %v401_v48 }
 0x18c   : > { %v667_v49 = vpop.eup %666 }
 0x18d   : > { %v406_v50 = vmul.f32 %v667_v49, %v567_v39 }
 0x18f   : > { %408 = vst [vmem:[%s165_s20] sm:$0xff] %v406_v50 }
 0x190   : > { %v669_v51 = vpop.eup %668 }
 0x191   : > { %v407_v52 = vmul.f32 %v669_v51, %v570_v43 }
 0x193   : > { %409 = vst [vmem:[%s165_s20 + $0x8] sm:$0xff] %v407_v52 }
 0x194   : > { %709 = shalt.err (!%p706_p3)
}
 0x195   : > { %s710_s4 = scalar_lea.hbm %s890_s27, 256  ;;  %s714_s7 = scalar_lea.hbm %s939_s2, 512 }
 0x196   : > { %p711_p5 = scmp.ne.s32.totalorder %s890_s27, %s710_s4  ;;  %p715_p9 = scmp.lt.s32.totalorder %s890_s27, %s939_s2 }
 0x197   : > { %p716_p12 = scmp.lt.s32.totalorder %s714_s7, %s710_s4 }
 0x198   : > { %p712_p6 = pnand %p711_p5, %p841_p4 }
 0x199   : > { %p717_p10 = por %p716_p12, %p715_p9 }
 0x19a   : > { %p713_p7 = pneg %p712_p6 }
 0x19c   : > { %p718_p11 = pnand %p717_p10, %p713_p7 }
 0x19e   : > { %721 = shalt.err (!%p718_p11)
}
 0x19f   : > { %s784_s16 = smov 128   ;;  %s785_s18 = smov 8  }
 0x1a0   : > { %576 = dma.vmem_to_hbm [thread:$0]  (%p841_p4), %s885_s23, 256, %s890_s27, %s892_s28, %s784_s16, %s784_s16, %s785_s18  }
 0x1a1 PF: > { %p588_p13 = scmp.ge.s32.totalorder %s776_s14, 2  ;;  %s441_s20 = sand.u32 1, %s756_s9  }
 0x1a2   : > { %s442_s24 = scalar_lea.sflag [#allocation4], %s441_s20 }
 0x1a3   : > { %p583_p0 = pnand %p588_p13, %p848_p8 }
 0x1a5   : > { %p584_p1 = pneg %p583_p0 }
 0x1a7   : > { %751 = dma.done.wait (%p584_p1), %s442_s24, 256  }
 0x1a8   : > { %753 = vsyncadd (%p584_p1), %s442_s24, 4294967040  ;;  %s16_s14 = sadd.s32 1, %s776_s14   ;;  %s944_s9 = smov %s760_s10 }
 0x1a9   : > { %p13_p2 = scmp.ge.s32.totalorder %s16_s14, 4   ;;  %s945_s10 = smov %s764_s11 }
 0x1aa   : > { %s946_s11 = smov %s854_s22  ;;  %s947_s12 = smov %s772_s13 }
 0x1ab   : > { %s948_s13 = smov %s950_s17  ;;  %15 = sbr.rel (!%p13_p2) target bundleno = 5 (0x5), region = 69 }
 0x1b0   :  { %447 = vsyncpa [#allocation3], 1 }
 0x1b1   :  { %449 = vsyncpa [#allocation3 + $0x1], 1 }
 0x1b2   :  { %450 = vsyncpa [#allocation4], 1 }
 0x1b3   :  { %452 = vsyncpa [#allocation4 + $0x1], 1 }

</bundles_post_ra>
